<compile_context>
chip_gen: v5e
topology: v5e:2x2
jax: 0.10.0
libtpu: 0.0.40
codegen_flags: <defaults>
</compile_context>

<pallas_src>
import functools

import jax
import jax.numpy as jnp
from jax import lax
from jax.experimental import pallas as pl
from jax.experimental.pallas import tpu as pltpu

LN_EPS = 1e-5  # nn.LayerNorm default


def _round_up(x, m):
    return ((x + m - 1) // m) * m


def bp_decoder_kernel(xs_ref, xd_ref, w1_ref, vecs_ref, w2_ref, b2_ref, o_ref,
                      *, latent, hidden):
    f32 = jnp.float32
    xs = xs_ref[...].astype(f32)                      # (TB, L), native-dtype load
    xd = xd_ref[...].astype(f32)                      # (TB, L)

    # --- Fused Linear-1 for both heads -------------------------------------
    # w1_ref is the block-diagonal (2L, 2H) weight; rows [:L] carry the sbp
    # head into lanes [:H], rows [L:] carry the dbp head into lanes [H:].
    # Two MXU matmuls (N = 2H <= 128 lanes => same push count as N = H),
    # summed into one (TB, 2H) hidden tile — no input concatenation needed.
    h = (jnp.dot(xs, w1_ref[0:latent, :], preferred_element_type=f32)
         + jnp.dot(xd, w1_ref[latent:2 * latent, :], preferred_element_type=f32)
         + vecs_ref[0:1, :])                          # + [b1_sbp | b1_dbp]

    # --- Per-head LayerNorm over H lanes (half-mask formulation, pure VPU) --
    lane = lax.broadcasted_iota(jnp.int32, (1, 2 * hidden), 1)
    m_s = (lane < hidden).astype(f32)                 # 1.0 on sbp lanes
    m_d = 1.0 - m_s                                   # 1.0 on dbp lanes
    inv_h = 1.0 / hidden

    mu_s = jnp.sum(h * m_s, axis=-1, keepdims=True) * inv_h
    mu_d = jnp.sum(h * m_d, axis=-1, keepdims=True) * inv_h
    c = h - (mu_s * m_s + mu_d * m_d)
    c2 = c * c
    var_s = jnp.sum(c2 * m_s, axis=-1, keepdims=True) * inv_h
    var_d = jnp.sum(c2 * m_d, axis=-1, keepdims=True) * inv_h
    rstd = (lax.rsqrt(var_s + LN_EPS) * m_s +
            lax.rsqrt(var_d + LN_EPS) * m_d)

    hn = c * rstd * vecs_ref[1:2, :] + vecs_ref[2:3, :]   # gamma, beta
    hr = jnp.maximum(hn, 0.0)                              # ReLU
    # TODO(synk): nn.Dropout(0.2) is eval-mode identity here; training-mode
    # masking would use pltpu.prng_seed + pltpu.prng_random_bits.

    # --- Fused Linear-2 for both heads --------------------------------------
    # Block-diagonal W2 (2H, 2): one MXU op yields the final (TB, 2) tile
    # (col 0 = sbp, col 1 = dbp), stored with a single assignment.
    out = jnp.dot(hr, w2_ref[...], preferred_element_type=f32) + b2_ref[...]
    o_ref[...] = out.astype(o_ref.dtype)


def bp_decoder_pallas(sbp_rep, dbp_rep, params_sbp, params_dbp, *,
                      batch_tile=8192):
    """sbp_rep / dbp_rep: (B, latent), native dtype (f32 or bf16).
    params_*: PyTorch-layout tuple
      (w1 (H,L), b1 (H,), ln_w (H,), ln_b (H,), w2 (1,H), b2 (1,)).
    Returns (B, 2) float32 with [:, 0] = sbp, [:, 1] = dbp."""
    B, L = sbp_rep.shape
    H = params_sbp[0].shape[0]

    def f32(a):
        return jnp.asarray(a, jnp.float32)

    w1s, b1s, gs, bes, w2s, b2s = map(f32, params_sbp)
    w1d, b1d, gd, bed, w2d, b2d = map(f32, params_dbp)

    # Block-diagonal Linear-1 weight (2L, 2H).
    w1_blk = jnp.zeros((2 * L, 2 * H), jnp.float32)
    w1_blk = w1_blk.at[:L, :H].set(w1s.T).at[L:, H:].set(w1d.T)

    # Packed per-lane vectors: row 0 = bias1, row 1 = LN gamma, row 2 = LN beta.
    vecs = jnp.stack([jnp.concatenate([b1s, b1d]),
                      jnp.concatenate([gs, gd]),
                      jnp.concatenate([bes, bed])], axis=0)      # (3, 2H)

    # Block-diagonal Linear-2 weight (2H, 2) + packed bias (1, 2).
    w2_blk = jnp.zeros((2 * H, 2), jnp.float32)
    w2_blk = w2_blk.at[:H, 0].set(w2s[0]).at[H:, 1].set(w2d[0])
    b2 = jnp.stack([b2s[0], b2d[0]]).reshape(1, 2)

    # Batch tiling: big tiles (~1 MiB of input per step at the default) so the
    # kernel is bandwidth- rather than overhead-bound; always >= 2 grid steps
    # when B > 8 so the "parallel" axis can use both v7x TensorCores.
    if B <= 8:
        tb = B
    else:
        tb = min(_round_up(batch_tile, 8), _round_up(pl.cdiv(B, 2), 8))
    grid = (pl.cdiv(B, tb),)

    batch_map = lambda i: (i, 0)
    const_map = lambda i: (0, 0)

    in_specs = [
        pl.BlockSpec((tb, L), batch_map),            # sbp representations
        pl.BlockSpec((tb, L), batch_map),            # dbp representations
        pl.BlockSpec(w1_blk.shape, const_map),       # VMEM-resident params
        pl.BlockSpec(vecs.shape, const_map),
        pl.BlockSpec(w2_blk.shape, const_map),
        pl.BlockSpec(b2.shape, const_map),
    ]
    out_spec = pl.BlockSpec((tb, 2), batch_map)

    kernel = functools.partial(bp_decoder_kernel, latent=L, hidden=H)

    return pl.pallas_call(
        kernel,
        out_shape=jax.ShapeDtypeStruct((B, 2), jnp.float32),
        grid=grid,
        in_specs=in_specs,
        out_specs=out_spec,
        compiler_params=pltpu.CompilerParams(
            dimension_semantics=("parallel",),       # batch tiles independent
            # ~24 MiB double-buffered footprint at tb=8192; <= 48 MiB is safe
            # on v7x's 64 MiB physical VMEM (and trivially on v5e/v6e).
            vmem_limit_bytes=48 * 1024 * 1024,
        ),
    )(sbp_rep, dbp_rep, w1_blk, vecs, w2_blk, b2)


def bp_decoder_ref(sbp_rep, dbp_rep, params_sbp, params_dbp):
    """Pure-JAX reference matching the PyTorch module (eval-mode dropout)."""
    def head(x, p):
        w1, b1, g, be, w2, b2 = p
        h = x @ w1.T + b1
        mu = h.mean(-1, keepdims=True)
        var = ((h - mu) ** 2).mean(-1, keepdims=True)
        h = (h - mu) / jnp.sqrt(var + LN_EPS) * g + be
        h = jnp.maximum(h, 0.0)
        return (h @ w2.T + b2)[:, 0]
    s = head(sbp_rep, params_sbp)
    d = head(dbp_rep, params_dbp)
    return jnp.stack([s, d], axis=1)


if __name__ == "__main__":
    B, LATENT, HIDDEN = 8, 16, 32
    key = jax.random.PRNGKey(0)
    k = jax.random.split(key, 14)

    sbp_rep = jax.random.normal(k[0], (B, LATENT), dtype=jnp.float32)
    dbp_rep = jax.random.normal(k[1], (B, LATENT), dtype=jnp.float32)

    def make_params(keys):
        kw1, kb1, kg, kbe, kw2, kb2 = keys
        w1 = 0.3 * jax.random.normal(kw1, (HIDDEN, LATENT), dtype=jnp.float32)  # lin1.weight
        b1 = 0.1 * jax.random.normal(kb1, (HIDDEN,), dtype=jnp.float32)         # lin1.bias
        g = 1.0 + 0.1 * jax.random.normal(kg, (HIDDEN,), dtype=jnp.float32)     # ln.weight
        be = 0.1 * jax.random.normal(kbe, (HIDDEN,), dtype=jnp.float32)         # ln.bias
        w2 = 0.3 * jax.random.normal(kw2, (1, HIDDEN), dtype=jnp.float32)       # lin2.weight
        b2 = 0.1 * jax.random.normal(kb2, (1,), dtype=jnp.float32)              # lin2.bias
        return (w1, b1, g, be, w2, b2)

    params_sbp = make_params(k[2:8])
    params_dbp = make_params(k[8:14])

    out = jax.block_until_ready(
        bp_decoder_pallas(sbp_rep, dbp_rep, params_sbp, params_dbp))
    ref = jax.block_until_ready(
        bp_decoder_ref(sbp_rep, dbp_rep, params_sbp, params_dbp))

    assert out.shape == (B, 2)
    assert jnp.allclose(out, ref, atol=1e-4, rtol=1e-4), \
        f"max err {jnp.max(jnp.abs(out - ref))}"
    print("KERNEL_OK")
</pallas_src>

<mosaic_0001>
module attributes {stable_mosaic.version = 11 : i64} {
  func.func @bp_decoder_kernel(%arg0: i32, %arg1: memref<8x16xf32, #tpu.memory_space<vmem>>, %arg2: memref<8x16xf32, #tpu.memory_space<vmem>>, %arg3: memref<32x64xf32, #tpu.memory_space<vmem>>, %arg4: memref<3x64xf32, #tpu.memory_space<vmem>>, %arg5: memref<64x2xf32, #tpu.memory_space<vmem>>, %arg6: memref<1x2xf32, #tpu.memory_space<vmem>>, %arg7: memref<8x2xf32, #tpu.memory_space<vmem>>) attributes {dimension_semantics = [#tpu.dimension_semantics<parallel>], iteration_bounds = array<i64: 1>, scalar_prefetch = 0 : i64, scratch_operands = 0 : i64, tpu.core_type = #tpu.core_type<tc>, window_params = [{transform_indices = @transform_0, window_bounds = array<i64: 8, 16>}, {transform_indices = @transform_1, window_bounds = array<i64: 8, 16>}, {pipeline_mode = #tpu.pipeline_mode<synchronous>, transform_indices = @transform_2, window_bounds = array<i64: 32, 64>}, {pipeline_mode = #tpu.pipeline_mode<synchronous>, transform_indices = @transform_3, window_bounds = array<i64: 3, 64>}, {pipeline_mode = #tpu.pipeline_mode<synchronous>, transform_indices = @transform_4, window_bounds = array<i64: 64, 2>}, {pipeline_mode = #tpu.pipeline_mode<synchronous>, transform_indices = @transform_5, window_bounds = array<i64: 1, 2>}, {transform_indices = @transform_6, window_bounds = array<i64: 8, 2>}]} {
    %c0 = arith.constant 0 : index
    %c0_0 = arith.constant 0 : index
    %0 = vector.load %arg1[%c0, %c0_0] : memref<8x16xf32, #tpu.memory_space<vmem>>, vector<8x16xf32>
    %c0_1 = arith.constant 0 : index
    %c0_2 = arith.constant 0 : index
    %1 = vector.load %arg2[%c0_1, %c0_2] : memref<8x16xf32, #tpu.memory_space<vmem>>, vector<8x16xf32>
    %c0_3 = arith.constant 0 : index
    %c0_4 = arith.constant 0 : index
    %2 = vector.load %arg3[%c0_3, %c0_4] : memref<32x64xf32, #tpu.memory_space<vmem>>, vector<16x64xf32>
    %cst = arith.constant dense<0.000000e+00> : vector<8x64xf32>
    %3 = tpu.matmul %0, %2, %cst {dimension_numbers = #tpu.dot_dimension_numbers<[1], [0], [0], [1], [0, 0, 1, 1], [], []>} : vector<8x16xf32>, vector<16x64xf32>, vector<8x64xf32> -> vector<8x64xf32>
    %c16 = arith.constant 16 : index
    %c0_5 = arith.constant 0 : index
    %4 = vector.load %arg3[%c16, %c0_5] : memref<32x64xf32, #tpu.memory_space<vmem>>, vector<16x64xf32>
    %cst_6 = arith.constant dense<0.000000e+00> : vector<8x64xf32>
    %5 = tpu.matmul %1, %4, %cst_6 {dimension_numbers = #tpu.dot_dimension_numbers<[1], [0], [0], [1], [0, 0, 1, 1], [], []>} : vector<8x16xf32>, vector<16x64xf32>, vector<8x64xf32> -> vector<8x64xf32>
    %6 = arith.addf %3, %5 : vector<8x64xf32>
    %c0_7 = arith.constant 0 : index
    %c0_8 = arith.constant 0 : index
    %7 = vector.load %arg4[%c0_7, %c0_8] : memref<3x64xf32, #tpu.memory_space<vmem>>, vector<1x64xf32>
    %8 = vector.broadcast %7 : vector<1x64xf32> to vector<8x64xf32>
    %9 = arith.addf %6, %8 : vector<8x64xf32>
    %10 = tpu.iota {dimensions = array<i32: 1>} : vector<1x64xi32>
    %c32_i32 = arith.constant 32 : i32
    %11 = vector.broadcast %c32_i32 : i32 to vector<1x64xi32>
    %12 = arith.cmpi slt, %10, %11 : vector<1x64xi32>
    %13 = arith.extui %12 : vector<1x64xi1> to vector<1x64xi32>
    %14 = arith.sitofp %13 : vector<1x64xi32> to vector<1x64xf32>
    %cst_9 = arith.constant 1.000000e+00 : f32
    %15 = vector.broadcast %cst_9 : f32 to vector<1x64xf32>
    %16 = arith.subf %15, %14 : vector<1x64xf32>
    %17 = vector.broadcast %14 : vector<1x64xf32> to vector<8x64xf32>
    %18 = arith.mulf %9, %17 : vector<8x64xf32>
    %cst_10 = arith.constant dense<0.000000e+00> : vector<8xf32>
    %19 = vector.multi_reduction <add>, %18, %cst_10 [1] : vector<8x64xf32> to vector<8xf32>
    %20 = vector.shape_cast %19 : vector<8xf32> to vector<8x1xf32>
    %cst_11 = arith.constant 3.125000e-02 : f32
    %21 = vector.broadcast %cst_11 : f32 to vector<8x1xf32>
    %22 = arith.mulf %20, %21 : vector<8x1xf32>
    %23 = vector.broadcast %16 : vector<1x64xf32> to vector<8x64xf32>
    %24 = arith.mulf %9, %23 : vector<8x64xf32>
    %cst_12 = arith.constant dense<0.000000e+00> : vector<8xf32>
    %25 = vector.multi_reduction <add>, %24, %cst_12 [1] : vector<8x64xf32> to vector<8xf32>
    %26 = vector.shape_cast %25 : vector<8xf32> to vector<8x1xf32>
    %cst_13 = arith.constant 3.125000e-02 : f32
    %27 = vector.broadcast %cst_13 : f32 to vector<8x1xf32>
    %28 = arith.mulf %26, %27 : vector<8x1xf32>
    %29 = vector.broadcast %22 : vector<8x1xf32> to vector<8x64xf32>
    %30 = vector.broadcast %14 : vector<1x64xf32> to vector<8x64xf32>
    %31 = arith.mulf %29, %30 : vector<8x64xf32>
    %32 = vector.broadcast %28 : vector<8x1xf32> to vector<8x64xf32>
    %33 = vector.broadcast %16 : vector<1x64xf32> to vector<8x64xf32>
    %34 = arith.mulf %32, %33 : vector<8x64xf32>
    %35 = arith.addf %31, %34 : vector<8x64xf32>
    %36 = arith.subf %9, %35 : vector<8x64xf32>
    %37 = arith.mulf %36, %36 : vector<8x64xf32>
    %38 = vector.broadcast %14 : vector<1x64xf32> to vector<8x64xf32>
    %39 = arith.mulf %37, %38 : vector<8x64xf32>
    %cst_14 = arith.constant dense<0.000000e+00> : vector<8xf32>
    %40 = vector.multi_reduction <add>, %39, %cst_14 [1] : vector<8x64xf32> to vector<8xf32>
    %41 = vector.shape_cast %40 : vector<8xf32> to vector<8x1xf32>
    %cst_15 = arith.constant 3.125000e-02 : f32
    %42 = vector.broadcast %cst_15 : f32 to vector<8x1xf32>
    %43 = arith.mulf %41, %42 : vector<8x1xf32>
    %44 = vector.broadcast %16 : vector<1x64xf32> to vector<8x64xf32>
    %45 = arith.mulf %37, %44 : vector<8x64xf32>
    %cst_16 = arith.constant dense<0.000000e+00> : vector<8xf32>
    %46 = vector.multi_reduction <add>, %45, %cst_16 [1] : vector<8x64xf32> to vector<8xf32>
    %47 = vector.shape_cast %46 : vector<8xf32> to vector<8x1xf32>
    %cst_17 = arith.constant 3.125000e-02 : f32
    %48 = vector.broadcast %cst_17 : f32 to vector<8x1xf32>
    %49 = arith.mulf %47, %48 : vector<8x1xf32>
    %cst_18 = arith.constant 9.99999974E-6 : f32
    %50 = vector.broadcast %cst_18 : f32 to vector<8x1xf32>
    %51 = arith.addf %43, %50 : vector<8x1xf32>
    %52 = math.rsqrt %51 : vector<8x1xf32>
    %53 = vector.broadcast %52 : vector<8x1xf32> to vector<8x64xf32>
    %54 = vector.broadcast %14 : vector<1x64xf32> to vector<8x64xf32>
    %55 = arith.mulf %53, %54 : vector<8x64xf32>
    %cst_19 = arith.constant 9.99999974E-6 : f32
    %56 = vector.broadcast %cst_19 : f32 to vector<8x1xf32>
    %57 = arith.addf %49, %56 : vector<8x1xf32>
    %58 = math.rsqrt %57 : vector<8x1xf32>
    %59 = vector.broadcast %58 : vector<8x1xf32> to vector<8x64xf32>
    %60 = vector.broadcast %16 : vector<1x64xf32> to vector<8x64xf32>
    %61 = arith.mulf %59, %60 : vector<8x64xf32>
    %62 = arith.addf %55, %61 : vector<8x64xf32>
    %63 = arith.mulf %36, %62 : vector<8x64xf32>
    %c1 = arith.constant 1 : index
    %c0_20 = arith.constant 0 : index
    %64 = vector.load %arg4[%c1, %c0_20] : memref<3x64xf32, #tpu.memory_space<vmem>>, vector<1x64xf32>
    %65 = vector.broadcast %64 : vector<1x64xf32> to vector<8x64xf32>
    %66 = arith.mulf %63, %65 : vector<8x64xf32>
    %c2 = arith.constant 2 : index
    %c0_21 = arith.constant 0 : index
    %67 = vector.load %arg4[%c2, %c0_21] : memref<3x64xf32, #tpu.memory_space<vmem>>, vector<1x64xf32>
    %68 = vector.broadcast %67 : vector<1x64xf32> to vector<8x64xf32>
    %69 = arith.addf %66, %68 : vector<8x64xf32>
    %cst_22 = arith.constant 0.000000e+00 : f32
    %70 = vector.broadcast %cst_22 : f32 to vector<8x64xf32>
    %71 = arith.maximumf %69, %70 : vector<8x64xf32>
    %c0_23 = arith.constant 0 : index
    %c0_24 = arith.constant 0 : index
    %72 = vector.load %arg5[%c0_23, %c0_24] : memref<64x2xf32, #tpu.memory_space<vmem>>, vector<64x2xf32>
    %cst_25 = arith.constant dense<0.000000e+00> : vector<8x2xf32>
    %73 = tpu.matmul %71, %72, %cst_25 {dimension_numbers = #tpu.dot_dimension_numbers<[1], [0], [0], [1], [0, 0, 1, 1], [], []>} : vector<8x64xf32>, vector<64x2xf32>, vector<8x2xf32> -> vector<8x2xf32>
    %c0_26 = arith.constant 0 : index
    %c0_27 = arith.constant 0 : index
    %74 = vector.load %arg6[%c0_26, %c0_27] : memref<1x2xf32, #tpu.memory_space<vmem>>, vector<1x2xf32>
    %75 = vector.broadcast %74 : vector<1x2xf32> to vector<8x2xf32>
    %76 = arith.addf %73, %75 : vector<8x2xf32>
    %c0_28 = arith.constant 0 : index
    %c0_29 = arith.constant 0 : index
    %77 = vector.load %arg7[%c0_28, %c0_29] : memref<8x2xf32, #tpu.memory_space<vmem>>, vector<8x2xf32>
    tpu.vector_store %arg7[%c0_28, %c0_29], %76 {strides = array<i32>} : memref<8x2xf32, #tpu.memory_space<vmem>>, vector<8x2xf32>,
    return
  }
  func.func @transform_0(%arg0: i32) -> (i32, i32) {
    %c0_i32 = arith.constant 0 : i32
    %c0_i32_0 = arith.constant 0 : i32
    return %arg0, %c0_i32 : i32, i32
  }
  func.func @transform_1(%arg0: i32) -> (i32, i32) {
    %c0_i32 = arith.constant 0 : i32
    %c0_i32_0 = arith.constant 0 : i32
    return %arg0, %c0_i32 : i32, i32
  }
  func.func @transform_2(%arg0: i32) -> (i32, i32) {
    %c0_i32 = arith.constant 0 : i32
    %c0_i32_0 = arith.constant 0 : i32
    %c0_i32_1 = arith.constant 0 : i32
    return %c0_i32, %c0_i32_0 : i32, i32
  }
  func.func @transform_3(%arg0: i32) -> (i32, i32) {
    %c0_i32 = arith.constant 0 : i32
    %c0_i32_0 = arith.constant 0 : i32
    %c0_i32_1 = arith.constant 0 : i32
    return %c0_i32, %c0_i32_0 : i32, i32
  }
  func.func @transform_4(%arg0: i32) -> (i32, i32) {
    %c0_i32 = arith.constant 0 : i32
    %c0_i32_0 = arith.constant 0 : i32
    %c0_i32_1 = arith.constant 0 : i32
    return %c0_i32, %c0_i32_0 : i32, i32
  }
  func.func @transform_5(%arg0: i32) -> (i32, i32) {
    %c0_i32 = arith.constant 0 : i32
    %c0_i32_0 = arith.constant 0 : i32
    %c0_i32_1 = arith.constant 0 : i32
    return %c0_i32, %c0_i32_0 : i32, i32
  }
  func.func @transform_6(%arg0: i32) -> (i32, i32) {
    %c0_i32 = arith.constant 0 : i32
    %c0_i32_0 = arith.constant 0 : i32
    return %arg0, %c0_i32 : i32, i32
  }
}

</mosaic_0001>

<bundles_post_ra>
// kernel: tpu_custom_call.1
= control target key start
LH: loop header
LB: loop body
LE: loop exit
PB: predicated region body
PF: predicated region fallthrough
CT: control target
= control target key end

     0   :  { %vm29_vm0 = vcmask 130048   ;;  %v79_v6 = vlaneseq  ;;  %v198_v13 = vmov 0.0   ;;  %vm86_vm2 = vcmask 523264   ;;  %s309_s2 = inlined_call_operand.vmem [shape: f32[32,64], index: 2, kind: input, shape index: {}]   ;;  %s310_s1 = inlined_call_operand.vmem [shape: f32[8,16], index: 1, kind: input, shape index: {}]   ;;  %s311_s0 = inlined_call_operand.vmem [shape: f32[8,16], index: 0, kind: input, shape index: {}]   ;;  %s312_s3 = inlined_call_operand.vmem [shape: f32[3,64], index: 3, kind: input, shape index: {}]   ;;  %s313_s5 = inlined_call_operand.vmem [shape: f32[1,2], index: 5, kind: input, shape index: {}]   ;;  %s314_s4 = inlined_call_operand.vmem [shape: f32[64,2], index: 4, kind: input, shape index: {}]   ;;  %s315_s6 = inlined_call_operand.vmem [shape: f32[8,2], index: 6, kind: output, shape index: {}]  }
   0x1   :  { %v28_v0 = vld [vmem:[%s309_s2 + $0x18] sm:$0xff]  ;;  %v26_v1 = vld [vmem:[%s309_s2 + $0x8] sm:$0xff]  ;;  %v27_v2 = vld [vmem:[%s309_s2 + $0x10] sm:$0xff]  ;;  %vm179_vm9 = vcmask 15360  }
   0x2   :  { %47 = vmatpush.msra.mxu0 %v28_v0  ;;  %70 = vmatpush.msra.mxu1 %v26_v1  ;;  %v25_v3 = vld [vmem:[%s309_s2] sm:$0xff]  ;;  %v80_v7 = vand.u32 127, %v79_v6  ;;  %v151_v33 = vld [vmem:[%s314_s4 + $0x38] sm:$0xff]  ;;  %v150_v34 = vld [vmem:[%s314_s4 + $0x30] sm:$0xff] }
   0x3   :  { %v24_v4 = vld [vmem:[%s310_s1] sm:$0xff]  ;;  %167 = vmatpush.msra.mxu2 %v151_v33  ;;  %v149_v35 = vld [vmem:[%s314_s4 + $0x28] sm:$0xff]  ;;  %v147_v39 = vld [vmem:[%s314_s4 + $0x18] sm:$0xff] }
   0x4   :  { %v23_v5 = vld [vmem:[%s311_s0] sm:$0xff]  ;;  %48 = vmatpush.msra.mxu0 %v27_v2  ;;  %71 = vmatpush.msra.mxu1 %v25_v3  ;;  %vm81_vm1 = vcmp.lt.s32.totalorder %v80_v7, 32  ;;  %v146_v41 = vld [vmem:[%s314_s4 + $0x10] sm:$0xff]  ;;  %v145_v42 = vld [vmem:[%s314_s4 + $0x8] sm:$0xff] }
   0x5   :  { %185 = vmatmul.msk.f32.vlgmr.msra.gmra.mxu0 %vm29_vm0, %v24_v4  ;;  %186 = vmatmul.msk.f32.vlgmr.msra.gmra.mxu1 %vm29_vm0, %v23_v5  ;;  %v190_v8 = vld [vmem:[%s312_s3] ss:$0 sm:$0xff]  ;;  %v255_v14 = vsel %vm81_vm1, 1.0, %v198_v13  ;;  %v191_v0 = vld [vmem:[%s312_s3 + $0x1] ss:$0 sm:$0xff] }
   0x6   :  { %v260_v17 = vsub.f32 1.0, %v255_v14  ;;  %168 = vmatpush.msra.mxu2 %v150_v34  ;;  %v148_v36 = vld [vmem:[%s314_s4 + $0x20] sm:$0xff] }
   0x7   :  { %v144_v43 = vld [vmem:[%s314_s4] sm:$0xff] }
   0x8   :  { %169 = vmatpush.msra.mxu2 %v149_v35  ;;  %v192_v2 = vld [vmem:[%s312_s3 + $0x2] ss:$0 sm:$0xff]  ;;  %v193_v6 = vld [vmem:[%s313_s5] ss:$0 sm:$0xff] }
   0xa   :  { %170 = vmatpush.msra.mxu2 %v148_v36 }
   0xc   :  { %171 = vmatpush.msra.mxu2 %v147_v39 }
   0xe   :  { %172 = vmatpush.msra.mxu2 %v146_v41 }
  0x10   :  { %173 = vmatpush.msra.mxu2 %v145_v42 }
  0x12   :  { %174 = vmatpush.msra.mxu2 %v144_v43 }
  0x82   :  { %v50_v9 = vpop.f32.mrf.mxu0  ;;  %v73_v10 = vpop.f32.mrf.mxu1 }
  0x83   :  { %v74_v11 = vadd.f32 %v73_v10, %v50_v9 }
  0x85   :  { %v78_v12 = vadd.f32 %v190_v8, %v74_v11 }
  0x87   :  { %v85_v15 = vmul.f32 %v255_v14, %v78_v12  ;;  %v91_v18 = vmul.f32 %v260_v17, %v78_v12 }
  0x89   :  { %v87_v16 = vsel %vm86_vm2, %v85_v15, 0.0  ;;  %v92_v19 = vsel %vm86_vm2, %v91_v18, 0.0 }
  0x8a   :  { %88 = vadd.xlane.f32.xlu0 %v87_v16 }
  0x92   :  { %93 = vadd.xlane.f32.xlu0 %v92_v19 }
  0xfd   :  { %v89_v20 = vpop.xlane.xlu0 %88 }
  0xfe   :  { %v90_v21 = vmul.f32 0.03125, %v89_v20 }
 0x100   :  { %v96_v24 = vmul.f32 %v255_v14, %v90_v21 }
 0x105   :  { %v94_v22 = vpop.xlane.xlu0 %93 }
 0x106   :  { %v95_v23 = vmul.f32 0.03125, %v94_v22 }
 0x108   :  { %v97_v25 = vmul.f32 %v95_v23, %v260_v17 }
 0x10a   :  { %v98_v26 = vadd.f32 %v97_v25, %v96_v24 }
 0x10c   :  { %v99_v27 = vsub.f32 %v78_v12, %v98_v26 }
 0x10e   :  { %v100_v28 = vmul.f32 %v99_v27, %v99_v27 }
 0x110   :  { %v101_v29 = vmul.f32 %v255_v14, %v100_v28  ;;  %v106_v31 = vmul.f32 %v100_v28, %v260_v17 }
 0x112   :  { %v102_v30 = vsel %vm86_vm2, %v101_v29, 0.0  ;;  %v107_v32 = vsel %vm86_vm2, %v106_v31, 0.0 }
 0x113   :  { %103 = vadd.xlane.f32.xlu1 %v102_v30 }
 0x11b   :  { %108 = vadd.xlane.f32.xlu1 %v107_v32 }
 0x186   :  { %v104_v37 = vpop.xlane.xlu1 %103 }
 0x187   :  { %v105_v38 = vmul.f32 0.03125, %v104_v37 }
 0x189   :  { %v111_v40 = vadd.f32 1e-05, %v105_v38 }
 0x18b   :  { %194 = vrsqrt.f32 %v111_v40  ;;  %vm118_vm4 = vweird.f32 %v111_v40 }
 0x18e   :  { %v109_v44 = vpop.xlane.xlu1 %108 }
 0x18f   :  { %v110_v45 = vmul.f32 0.03125, %v109_v44 }
 0x191   :  { %v195_v46 = vpop.eup %194  ;;  %v123_v47 = vadd.f32 1e-05, %v110_v45 }
 0x192   :  { %v113_v48 = vmul.f32 %v195_v46, %v111_v40  ;;  %vm119_vm3 = vweird.f32 %v195_v46 }
 0x193   :  { %196 = vrsqrt.f32 %v123_v47  ;;  %vm120_vm6 = vmor %vm118_vm4, %vm119_vm3  ;;  %vm130_vm7 = vweird.f32 %v123_v47 }
 0x194   :  { %v114_v49 = vmul.f32 %v195_v46, %v113_v48 }
 0x196   :  { %v115_v50 = vmul.f32 0.5, %v114_v49 }
 0x198   :  { %v116_v52 = vsub.f32 1.5, %v115_v50 }
 0x199   :  { %v197_v51 = vpop.eup %196 }
 0x19a   :  { %v125_v53 = vmul.f32 %v197_v51, %v123_v47  ;;  %v117_v55 = vmul.f32 %v195_v46, %v116_v52  ;;  %vm131_vm5 = vweird.f32 %v197_v51 }
 0x19b   :  { %vm132_vm8 = vmor %vm130_vm7, %vm131_vm5 }
 0x19c   :  { %v126_v54 = vmul.f32 %v197_v51, %v125_v53  ;;  %v121_v58 = vsel %vm120_vm6, %v195_v46, %v117_v55 }
 0x19d   :  { %v122_v61 = vmul.f32 %v255_v14, %v121_v58 }
 0x19e   :  { %v127_v56 = vmul.f32 0.5, %v126_v54 }
 0x1a0   :  { %v128_v57 = vsub.f32 1.5, %v127_v56 }
 0x1a2   :  { %v129_v59 = vmul.f32 %v197_v51, %v128_v57 }
 0x1a4   :  { %v133_v60 = vsel %vm132_vm8, %v197_v51, %v129_v59 }
 0x1a5   :  { %v134_v62 = vmul.f32 %v133_v60, %v260_v17 }
 0x1a7   :  { %v135_v63 = vadd.f32 %v134_v62, %v122_v61 }
 0x1a9   :  { %v136_v1 = vmul.f32 %v135_v63, %v99_v27 }
 0x1ab   :  { %v139_v3 = vmul.f32 %v191_v0, %v136_v1 }
 0x1ad   :  { %v142_v4 = vadd.f32 %v192_v2, %v139_v3 }
 0x1af   :  { %v143_v5 = vmax.f32 %v142_v4, 0.0 }
 0x1b1   :  { %188 = vmatmul.msk.f32.vlgmr.msra.gmra.mxu2 %vm86_vm2, %v143_v5 }
 0x234   :  { %v176_v7 = vpop.f32.mrf.mxu2 }
 0x235   :  { %v177_v8 = vadd.f32 %v193_v6, %v176_v7 }
 0x237   :  { %180 = vst.msk [vmem:[%s315_s6] sm:$0xff] %vm179_vm9, %v177_v8 }

</bundles_post_ra>
